<compile_context>
chip_gen: v6e
topology: v6e:2x2x1
jax: 0.10.0
libtpu: 0.0.40
codegen_flags: <defaults>
</compile_context>

<pallas_src>
import functools

import numpy as np
import jax
import jax.numpy as jnp
from jax import lax
from jax.experimental import pallas as pl
from jax.experimental.pallas import tpu as pltpu


def _preemphasis_kernel(x_ref, o_ref, *, coef):
    """x_ref/o_ref: (block_rows, T) f32 tiles; lane axis = time."""
    x = x_ref[...]
    T = x.shape[-1]

    # prev[:, t] = x[:, t-1]   (column 0 wraps to x[:, T-1]; fixed below)
    prev = pltpu.roll(x, shift=1, axis=1)
    # nxt[:, t] = x[:, t+1]    (only column 0 is consumed -> x[:, 1], the reflect value)
    nxt = pltpu.roll(x, shift=T - 1, axis=1)

    t_idx = lax.broadcasted_iota(jnp.int32, x.shape, dimension=1)
    prev = jnp.where(t_idx == 0, nxt, prev)      # reflect pad: x[:, -1] := x[:, 1]

    o_ref[...] = x - coef * prev


def preemphasis(x, coef: float = 0.97, *, block_rows=None):
    """Pallas implementation of PreEmphasis.forward for a 2-D (batch, samples) input."""
    assert x.ndim == 2, "The number of dimensions of input tensor must be 2!"
    B, T = x.shape

    if block_rows is None:
        # >=2 sublane-aligned row blocks when the batch allows it (megacore /
        # pipelining); otherwise one block covering the whole (small) batch.
        block_rows = 8 if (B % 16 == 0) else B
    if B % block_rows != 0:
        block_rows = B

    grid = (B // block_rows,)
    kernel = functools.partial(_preemphasis_kernel, coef=float(coef))

    return pl.pallas_call(
        kernel,
        out_shape=jax.ShapeDtypeStruct((B, T), x.dtype),
        grid=grid,
        in_specs=[pl.BlockSpec((block_rows, T), lambda i: (i, 0))],
        out_specs=pl.BlockSpec((block_rows, T), lambda i: (i, 0)),
        compiler_params=pltpu.CompilerParams(
            dimension_semantics=("parallel",)),
    )(x)


def ref_preemphasis(x, coef: float = 0.97):
    """Pure-JAX reference of the PyTorch module: reflect-pad(1,0) + conv1d([-coef, 1])."""
    xp = jnp.pad(x, ((0, 0), (1, 0)), mode="reflect")
    return xp[:, 1:] - coef * xp[:, :-1]


if __name__ == "__main__":
    key = jax.random.PRNGKey(0)

    # (batch, samples): small audio-like input; T is a multiple of 128 (lane-dense).
    B, T = 16, 2048
    x = jax.random.normal(key, (B, T), jnp.float32)

    out = preemphasis(x, coef=0.97)
    out = jax.block_until_ready(out)
    assert out.shape == (B, T)

    ref = ref_preemphasis(x, coef=0.97)
    np.testing.assert_allclose(np.asarray(out), np.asarray(ref), rtol=1e-6, atol=1e-6)

    print("KERNEL_OK")
</pallas_src>

<mosaic_0001>
module attributes {stable_mosaic.version = 11 : i64} {
  func.func @_preemphasis_kernel(%arg0: i32, %arg1: memref<8x2048xf32, #tpu.memory_space<vmem>>, %arg2: memref<8x2048xf32, #tpu.memory_space<vmem>>) attributes {dimension_semantics = [#tpu.dimension_semantics<parallel>], iteration_bounds = array<i64: 2>, scalar_prefetch = 0 : i64, scratch_operands = 0 : i64, tpu.core_type = #tpu.core_type<tc>, window_params = [{transform_indices = @transform_0, window_bounds = array<i64: 8, 2048>}, {transform_indices = @transform_1, window_bounds = array<i64: 8, 2048>}]} {
    %c0 = arith.constant 0 : index
    %c0_0 = arith.constant 0 : index
    %0 = vector.load %arg1[%c0, %c0_0] : memref<8x2048xf32, #tpu.memory_space<vmem>>, vector<8x2048xf32>
    %c1_i32 = arith.constant 1 : i32
    %1 = tpu.dynamic_rotate %0 by %c1_i32 dim 1 : vector<8x2048xf32>, i32 -> vector<8x2048xf32>
    %c2047_i32 = arith.constant 2047 : i32
    %2 = tpu.dynamic_rotate %0 by %c2047_i32 dim 1 : vector<8x2048xf32>, i32 -> vector<8x2048xf32>
    %3 = tpu.iota {dimensions = array<i32: 1>} : vector<8x2048xi32>
    %c0_i32 = arith.constant 0 : i32
    %4 = vector.broadcast %c0_i32 : i32 to vector<8x2048xi32>
    %5 = arith.cmpi eq, %3, %4 : vector<8x2048xi32>
    %6 = arith.select %5, %2, %1 : vector<8x2048xi1>, vector<8x2048xf32>
    %cst = arith.constant 9.700000e-01 : f32
    %7 = vector.broadcast %cst : f32 to vector<8x2048xf32>
    %8 = arith.mulf %7, %6 : vector<8x2048xf32>
    %9 = arith.subf %0, %8 : vector<8x2048xf32>
    %c0_1 = arith.constant 0 : index
    %c0_2 = arith.constant 0 : index
    %10 = vector.load %arg2[%c0_1, %c0_2] : memref<8x2048xf32, #tpu.memory_space<vmem>>, vector<8x2048xf32>
    tpu.vector_store %arg2[%c0_1, %c0_2], %9 {strides = array<i32>} : memref<8x2048xf32, #tpu.memory_space<vmem>>, vector<8x2048xf32>,
    return
  }
  func.func @transform_0(%arg0: i32) -> (i32, i32) {
    %c0_i32 = arith.constant 0 : i32
    %c0_i32_0 = arith.constant 0 : i32
    return %arg0, %c0_i32 : i32, i32
  }
  func.func @transform_1(%arg0: i32) -> (i32, i32) {
    %c0_i32 = arith.constant 0 : i32
    %c0_i32_0 = arith.constant 0 : i32
    return %arg0, %c0_i32 : i32, i32
  }
}

</mosaic_0001>

<bundles_post_ra>
// kernel: tpu_custom_call.1
= control target key start
LH: loop header
LB: loop body
LE: loop exit
PB: predicated region body
PF: predicated region fallthrough
CT: control target
= control target key end

     0   :  { %6 = vsyncpa [#allocation3], 0  ;;  %s900_s0 = inlined_call_operand.hbm [shape: f32[16,2048], index: 0, kind: input, shape index: {}]   ;;  %s901_s1 = inlined_call_operand.hbm [shape: f32[16,2048], index: 1, kind: output, shape index: {}]  }
   0x1   :  { %8 = vsyncpa [#allocation3 + $0x1], 0 }
   0x2   :  { %9 = vsyncpa [#allocation4], 0 }
   0x3   :  { %11 = vsyncpa [#allocation4 + $0x1], 0  ;;  %s601_s6 = smov 0   ;;  %s603_s7 = smov 0  }
   0x4   :  { %s605_s8 = smov 0   ;;  %s607_s9 = smov 0  }
   0x5 LB: > { %s622_s10 = sadd.s32 4294967295, %s585_s9   ;;  %s429_s11 = sadd.s32 4294967294, %s585_s9   ;;  %s585_s9 = sphi %s607_s9, %s918_s9   ;;  %s581_s8 = sphi %s605_s8, %s917_s8   ;;  %s577_s7 = sphi %s603_s7, %s916_s7   ;;  %s573_s6 = sphi %s601_s6, %s915_s6  }
   0x6   : > { %s626_s12 = sadd.s32 1, %s585_s9   ;;  %s24_s13 = sadd.s32 1, %s581_s8 }
   0x7   : > { %s21_s14 = ssub.s32 %s585_s9, %s626_s12  ;;  %p31_p0 = scmp.ne.s32.totalorder %s581_s8, %s577_s7 }
   0x8   : > { %p22_p1 = scmp.eq.s32.totalorder %s21_s14, 0  ;;  %p32_p2 = scmp.eq.s32.totalorder %s585_s9, 0 }
   0x9   : > { %p37_p3 = scmp.ne.s32.totalorder %s577_s7, %s573_s6  ;;  %p38_p4 = scmp.eq.s32.totalorder %s622_s10, 0 }
   0xa   : > { %s638_s15 = scalar_select %p22_p1, %s581_s8, %s24_s13  }
   0xb   : > { %p640_p5 = por %p32_p2, %p31_p0  ;;  %p644_p6 = por %p38_p4, %p37_p3 }
   0xc   : > { %p61_p7 = scmp.eq.s32.totalorder %s622_s10, 1  ;;  %p67_p8 = scmp.eq.s32.totalorder %s429_s11, 1 }
   0xd   : > { %s905_s17 = scalar_select %p644_p6, 1, 0 }
   0xe   : > { %p457_p10 = scmp.lt.s32.totalorder %s585_s9, 2  ;;  %p651_p11 = por %p61_p7, %p31_p0 }
   0xf   : > { %p655_p12 = por %p67_p8, %p37_p3  ;;  %s87_s20 = sand.u32 1, %s581_s8  }
  0x10   : > { %s906_s18 = scalar_select %p651_p11, 1, 0 }
  0x11   : > { %s907_s19 = scalar_select %p655_p12, 1, 0 }
  0x12   : > { %s443_s21 = sshll.u32 %s585_s9, 11  ;;  %s432_s22 = sshll.u32 %s87_s20, 7 }
  0x13   : > { %s664_s25 = scalar_lea.hbm %s900_s0, %s443_s21  ;;  %s91_s26 = scalar_lea.vmem [#allocation2], %s432_s22 }
  0x14   : > { %s99_s27 = sshll.u32 %s91_s26, 4  ;;  %p668_p13 = pnand %p457_p10, %p640_p5  ;;  %s672_s27 = int_to_ptr.vmem [resolvable:$true] %s99_s27 }
  0x15   : > { %s88_s29 = scalar_lea.sflag [#allocation3], %s87_s20  ;;  %s493_s30 = scalar_lea.hbm %s664_s25, 2048 }
  0x16   : > { %p494_p2 = scmp.ne.s32.totalorder %s664_s25, %s493_s30  ;;  %p495_p3 = pneg %p668_p13 }
  0x17   : > { %s498_s4 = scalar_lea.hbm %s900_s0, 4096  ;;  %p499_p5 = scmp.lt.s32.totalorder %s664_s25, %s900_s0 }
  0x18   : > { %p496_p4 = pnand %p495_p3, %p494_p2  ;;  %p500_p8 = scmp.lt.s32.totalorder %s498_s4, %s493_s30 }
  0x1a   : > { %p497_p7 = pneg %p496_p4  ;;  %p501_p10 = por %p500_p8, %p499_p5 }
  0x1c   : > { %p502_p9 = pnand %p501_p10, %p497_p7 }
  0x1e   : > { %505 = shalt.err (!%p502_p9)
}
  0x1f   : > { %s506_s13 = scalar_lea.vmem %s672_s27, 2048  ;;  %s587_s14 = smov [#allocation2]  }
  0x20   : > { %p507_p0 = scmp.ne.s32.totalorder %s672_s27, %s506_s13  ;;  %s511_s16 = sshll.u32 %s587_s14, 4  ;;  %s512_s16 = int_to_ptr.vmem [resolvable:$false] %s511_s16 }
  0x21   : > { %s513_s20 = scalar_lea.vmem %s512_s16, 4096  ;;  %p514_p4 = scmp.lt.s32.totalorder %s672_s27, %s512_s16 }
  0x22   : > { %p509_p1 = pnand %p507_p0, %p495_p3  ;;  %p515_p12 = scmp.lt.s32.totalorder %s513_s20, %s506_s13 }
  0x24   : > { %p510_p2 = pneg %p509_p1  ;;  %p516_p11 = por %p515_p12, %p514_p4 }
  0x26   : > { %p517_p6 = pnand %p516_p11, %p510_p2 }
  0x28   : > { %520 = shalt.err (!%p517_p6)
}
  0x29   : > { %452 = dma.hbm_to_vmem [thread:$0]  (!%p668_p13), %s664_s25, 2048, %s672_s27, %s88_s29  }
  0x2a   : > { %p909_p9 = scmp.lt.s32.totalorder %s585_s9, 3  ;;  %p910_p7 = scmp.ge.s32.totalorder %s585_s9, 1 }
  0x2c   : > { %p105_p0 = pnand %p910_p7, %p909_p9 }
  0x2d   : > { %s699_s21 = sand.u32 (!%p105_p0), 1, %s577_s7   ;;  %p911_p6 = scmp.ne.s32.totalorder (!%p105_p0), %s905_s17, 0 }
  0x2e   : > { %108 = sbr.rel (%p105_p0) target bundleno = 219 (0xdb), region = 24  ;;  %s436_s22 = sshll.u32 (!%p105_p0), %s699_s21, 7 }
  0x2f   : > { %s111_s23 = scalar_lea.sflag (!%p105_p0), [#allocation3], %s699_s21  ;;  %s705_s24 = scalar_lea.vmem (!%p105_p0), [#allocation2], %s436_s22 }
  0x33   : > { %564 = dma.done.wait (%p911_p6), %s111_s23, 2048  }
  0x34   : > { %566 = vsyncadd (%p911_p6), %s111_s23, 4294965248  ;;  %v133_v0 = vld [vmem:[%s705_s24] sm:$0xff]  ;;  %s588_s25 = smov 127   ;;  %s589_s26 = smov 1   ;;  %v134_v1 = vld [vmem:[%s705_s24 + $0x8] sm:$0xff]  ;;  %v181_v16 = vlaneseq }
  0x35   : > { %200 = vrot.lane.b32.xlu1 %v133_v0, %s588_s25  ;;  %149 = vrot.lane.b32.xlu0 %v133_v0, %s589_s26  ;;  %v715_v2 = vld [vmem:[%s705_s24 + $0x78] sm:$0xff]  ;;  %v135_v3 = vld [vmem:[%s705_s24 + $0x10] sm:$0xff]  ;;  %s795_s17 = scalar_lea.vmem [#allocation5], %s436_s22  ;;  %s444_s27 = sshll.u32 %s622_s10, 11 }
  0x36   : > { %v723_v4 = vld [vmem:[%s705_s24 + $0x20] sm:$0xff]  ;;  %v136_v5 = vld [vmem:[%s705_s24 + $0x18] sm:$0xff]  ;;  %v730_v6 = vld [vmem:[%s705_s24 + $0x30] sm:$0xff]  ;;  %v779_v17 = vand.u32 127, %v181_v16  ;;  %s359_s28 = sshll.u32 %s795_s17, 4  ;;  %s854_s2 = scalar_lea.hbm %s901_s1, %s444_s27  ;;  %s856_s28 = int_to_ptr.vmem [resolvable:$true] %s359_s28 }
  0x37   : > { %v733_v7 = vld [vmem:[%s705_s24 + $0x28] sm:$0xff]  ;;  %v740_v8 = vld [vmem:[%s705_s24 + $0x40] sm:$0xff]  ;;  %v743_v9 = vld [vmem:[%s705_s24 + $0x38] sm:$0xff]  ;;  %s345_s10 = scalar_lea.sflag [#allocation4], %s699_s21  ;;  %s521_s3 = scalar_lea.vmem %s856_s28, 2048 }
  0x38   : > { %v750_v10 = vld [vmem:[%s705_s24 + $0x50] sm:$0xff]  ;;  %v753_v11 = vld [vmem:[%s705_s24 + $0x48] sm:$0xff]  ;;  %v760_v12 = vld [vmem:[%s705_s24 + $0x60] sm:$0xff]  ;;  %vm183_vm0 = vcmp.lt.s32.totalorder %v779_v17, 1  ;;  %vm232_vm1 = vcmp.lt.s32.totalorder %v779_v17, 127  ;;  %vm264_vm2 = vcmp.eq.s32.totalorder %v779_v17, 0  ;;  %p522_p11 = scmp.ne.s32.totalorder %s856_s28, %s521_s3 }
  0x39   : > { %202 = vrot.lane.b32.xlu1 %v134_v1, %s588_s25  ;;  %179 = vrot.lane.b32.xlu0 %v715_v2, %s589_s26  ;;  %v763_v13 = vld [vmem:[%s705_s24 + $0x58] sm:$0xff]  ;;  %v770_v14 = vld [vmem:[%s705_s24 + $0x70] sm:$0xff]  ;;  %p912_p12 = scmp.ne.s32.totalorder %s906_s18, 0  ;;  %s590_s4 = smov [#allocation5]  }
  0x3a   : > { %v773_v15 = vld [vmem:[%s705_s24 + $0x68] sm:$0xff]  ;;  %s525_s5 = sshll.u32 %s590_s4, 4  ;;  %s526_s5 = int_to_ptr.vmem [resolvable:$false] %s525_s5 }
  0x3b   : > { %p523_p13 = pnand %p522_p11, %p912_p12  ;;  %s527_s11 = scalar_lea.vmem %s526_s5, 4096 }
  0x3c   : > { %p528_p3 = scmp.lt.s32.totalorder %s856_s28, %s526_s5  ;;  %p529_p5 = scmp.lt.s32.totalorder %s527_s11, %s521_s3 }
  0x3d   : > { %153 = vrot.lane.b32.xlu1 %v135_v3, %s589_s26  ;;  %151 = vrot.lane.b32.xlu0 %v134_v1, %s589_s26  ;;  %p524_p1 = pneg %p523_p13 }
  0x3e   : > { %p530_p8 = por %p529_p5, %p528_p3 }
  0x40   : > { %p531_p10 = pnand %p530_p8, %p524_p1 }
  0x41   : > { %157 = vrot.lane.b32.xlu1 %v723_v4, %s589_s26  ;;  %155 = vrot.lane.b32.xlu0 %v136_v5, %s589_s26 }
  0x45   : > { %161 = vrot.lane.b32.xlu1 %v730_v6, %s589_s26  ;;  %159 = vrot.lane.b32.xlu0 %v733_v7, %s589_s26 }
  0x49   : > { %165 = vrot.lane.b32.xlu1 %v740_v8, %s589_s26  ;;  %163 = vrot.lane.b32.xlu0 %v743_v9, %s589_s26 }
  0x4d   : > { %169 = vrot.lane.b32.xlu1 %v750_v10, %s589_s26  ;;  %167 = vrot.lane.b32.xlu0 %v753_v11, %s589_s26 }
  0x51   : > { %173 = vrot.lane.b32.xlu1 %v760_v12, %s589_s26  ;;  %171 = vrot.lane.b32.xlu0 %v763_v13, %s589_s26 }
  0x55   : > { %177 = vrot.lane.b32.xlu1 %v770_v14, %s589_s26  ;;  %175 = vrot.lane.b32.xlu0 %v773_v15, %s589_s26 }
  0xa7   : > { %v201_v18 = vpop.permute.xlu1 %200  ;;  %v150_v19 = vpop.permute.xlu0 %149 }
  0xab   : > { %v203_v20 = vpop.permute.xlu1 %202  ;;  %v784_v21 = vpop.permute.xlu0 %179 }
  0xac   : > { %v247_v22 = vsel %vm232_vm1, %v201_v18, %v203_v20  ;;  %v199_v23 = vsel %vm183_vm0, %v784_v21, %v150_v19 }
  0xad   : > { %v280_v24 = vsel %vm264_vm2, %v247_v22, %v199_v23 }
  0xae   : > { %v296_v25 = vmul.f32 0.97, %v280_v24 }
  0xaf   : > { %v154_v26 = vpop.permute.xlu1 %153  ;;  %v152_v27 = vpop.permute.xlu0 %151 }
  0xb0   : > { %v312_v28 = vsub.f32 %v133_v0, %v296_v25  ;;  %v197_v29 = vsel %vm183_vm0, %v152_v27, %v154_v26  ;;  %v198_v30 = vsel %vm183_vm0, %v150_v19, %v152_v27 }
  0xb1   : > { %v297_v31 = vmul.f32 0.97, %v198_v30  ;;  %v298_v32 = vmul.f32 0.97, %v197_v29 }
  0xb2   : > { %328 = vst [vmem:[%s795_s17] sm:$0xff] %v312_v28 }
  0xb3   : > { %v313_v33 = vsub.f32 %v134_v1, %v297_v31  ;;  %v314_v34 = vsub.f32 %v135_v3, %v298_v32  ;;  %v158_v35 = vpop.permute.xlu1 %157  ;;  %v156_v36 = vpop.permute.xlu0 %155 }
  0xb4   : > { %v195_v37 = vsel %vm183_vm0, %v156_v36, %v158_v35  ;;  %v196_v38 = vsel %vm183_vm0, %v154_v26, %v156_v36 }
  0xb5   : > { %329 = vst [vmem:[%s795_s17 + $0x8] sm:$0xff] %v313_v33  ;;  %330 = vst [vmem:[%s795_s17 + $0x10] sm:$0xff] %v314_v34  ;;  %v299_v39 = vmul.f32 0.97, %v196_v38  ;;  %v300_v40 = vmul.f32 0.97, %v195_v37 }
  0xb7   : > { %v315_v41 = vsub.f32 %v136_v5, %v299_v39  ;;  %v316_v42 = vsub.f32 %v723_v4, %v300_v40  ;;  %v162_v43 = vpop.permute.xlu1 %161  ;;  %v160_v44 = vpop.permute.xlu0 %159 }
  0xb8   : > { %v193_v45 = vsel %vm183_vm0, %v160_v44, %v162_v43  ;;  %v194_v46 = vsel %vm183_vm0, %v158_v35, %v160_v44 }
  0xb9   : > { %331 = vst [vmem:[%s795_s17 + $0x18] sm:$0xff] %v315_v41  ;;  %332 = vst [vmem:[%s795_s17 + $0x20] sm:$0xff] %v316_v42  ;;  %v301_v47 = vmul.f32 0.97, %v194_v46  ;;  %v302_v48 = vmul.f32 0.97, %v193_v45 }
  0xbb   : > { %v317_v49 = vsub.f32 %v733_v7, %v301_v47  ;;  %v318_v50 = vsub.f32 %v730_v6, %v302_v48  ;;  %v166_v51 = vpop.permute.xlu1 %165  ;;  %v164_v52 = vpop.permute.xlu0 %163 }
  0xbc   : > { %v191_v53 = vsel %vm183_vm0, %v164_v52, %v166_v51  ;;  %v192_v54 = vsel %vm183_vm0, %v162_v43, %v164_v52 }
  0xbd   : > { %333 = vst [vmem:[%s795_s17 + $0x28] sm:$0xff] %v317_v49  ;;  %334 = vst [vmem:[%s795_s17 + $0x30] sm:$0xff] %v318_v50  ;;  %v303_v55 = vmul.f32 0.97, %v192_v54  ;;  %v304_v56 = vmul.f32 0.97, %v191_v53 }
  0xbf   : > { %v319_v57 = vsub.f32 %v743_v9, %v303_v55  ;;  %v320_v58 = vsub.f32 %v740_v8, %v304_v56  ;;  %v170_v59 = vpop.permute.xlu1 %169  ;;  %v168_v60 = vpop.permute.xlu0 %167 }
  0xc0   : > { %v189_v61 = vsel %vm183_vm0, %v168_v60, %v170_v59  ;;  %v190_v62 = vsel %vm183_vm0, %v166_v51, %v168_v60 }
  0xc1   : > { %335 = vst [vmem:[%s795_s17 + $0x38] sm:$0xff] %v319_v57  ;;  %336 = vst [vmem:[%s795_s17 + $0x40] sm:$0xff] %v320_v58  ;;  %v305_v63 = vmul.f32 0.97, %v190_v62  ;;  %v306_v0 = vmul.f32 0.97, %v189_v61 }
  0xc3   : > { %v321_v1 = vsub.f32 %v753_v11, %v305_v63  ;;  %v322_v3 = vsub.f32 %v750_v10, %v306_v0  ;;  %v174_v4 = vpop.permute.xlu1 %173  ;;  %v172_v5 = vpop.permute.xlu0 %171 }
  0xc4   : > { %v187_v6 = vsel %vm183_vm0, %v172_v5, %v174_v4  ;;  %v188_v7 = vsel %vm183_vm0, %v170_v59, %v172_v5 }
  0xc5   : > { %337 = vst [vmem:[%s795_s17 + $0x48] sm:$0xff] %v321_v1  ;;  %338 = vst [vmem:[%s795_s17 + $0x50] sm:$0xff] %v322_v3  ;;  %v307_v8 = vmul.f32 0.97, %v188_v7  ;;  %v308_v9 = vmul.f32 0.97, %v187_v6 }
  0xc7   : > { %v323_v11 = vsub.f32 %v763_v13, %v307_v8  ;;  %v324_v10 = vsub.f32 %v760_v12, %v308_v9  ;;  %v178_v16 = vpop.permute.xlu1 %177  ;;  %v176_v18 = vpop.permute.xlu0 %175 }
  0xc8   : > { %v184_v19 = vsel %vm183_vm0, %v178_v16, %v784_v21  ;;  %v185_v20 = vsel %vm183_vm0, %v176_v18, %v178_v16  ;;  %v186_v22 = vsel %vm183_vm0, %v174_v4, %v176_v18 }
  0xc9   : > { %339 = vst [vmem:[%s795_s17 + $0x58] sm:$0xff] %v323_v11  ;;  %340 = vst [vmem:[%s795_s17 + $0x60] sm:$0xff] %v324_v10  ;;  %v311_v12 = vmul.f32 0.97, %v184_v19  ;;  %v309_v13 = vmul.f32 0.97, %v186_v22 }
  0xca   : > { %v310_v23 = vmul.f32 0.97, %v185_v20 }
  0xcb   : > { %v327_v24 = vsub.f32 %v715_v2, %v311_v12  ;;  %v325_v21 = vsub.f32 %v773_v15, %v309_v13 }
  0xcc   : > { %v326_v25 = vsub.f32 %v770_v14, %v310_v23 }
  0xcd   : > { %343 = vst [vmem:[%s795_s17 + $0x78] sm:$0xff] %v327_v24  ;;  %341 = vst [vmem:[%s795_s17 + $0x68] sm:$0xff] %v325_v21 }
  0xce   : > { %342 = vst [vmem:[%s795_s17 + $0x70] sm:$0xff] %v326_v25 }
  0xcf   : > { %534 = shalt.err (!%p531_p10)
}
  0xd0   : > { %s535_s13 = scalar_lea.hbm %s854_s2, 2048  ;;  %s539_s20 = scalar_lea.hbm %s901_s1, 4096 }
  0xd1   : > { %p536_p2 = scmp.ne.s32.totalorder %s854_s2, %s535_s13  ;;  %p540_p7 = scmp.lt.s32.totalorder %s854_s2, %s901_s1 }
  0xd2   : > { %p541_p0 = scmp.lt.s32.totalorder %s539_s20, %s535_s13 }
  0xd3   : > { %p537_p4 = pnand %p536_p2, %p912_p12 }
  0xd4   : > { %p542_p6 = por %p541_p0, %p540_p7 }
  0xd5   : > { %p538_p9 = pneg %p537_p4 }
  0xd7   : > { %p543_p11 = pnand %p542_p6, %p538_p9 }
  0xd9   : > { %546 = shalt.err (!%p543_p11)
}
  0xda   : > { %447 = dma.vmem_to_hbm [thread:$0]  (%p912_p12), %s856_s28, 2048, %s854_s2, %s345_s10  }
  0xdb PF: > { %s371_s23 = sand.u32 1, %s573_s6   ;;  %p913_p13 = scmp.ne.s32.totalorder %s907_s19, 0 }
  0xdc   : > { %p914_p1 = scmp.ge.s32.totalorder %s585_s9, 2  ;;  %s372_s24 = scalar_lea.sflag [#allocation4], %s371_s23 }
  0xde   : > { %p454_p3 = pnand %p914_p1, %p913_p13 }
  0xe0   : > { %p455_p5 = pneg %p454_p3 }
  0xe2   : > { %568 = dma.done.wait (%p455_p5), %s372_s24, 2048  }
  0xe3   : > { %570 = vsyncadd (%p455_p5), %s372_s24, 4294965248  ;;  %p14_p8 = scmp.ge.s32.totalorder %s626_s12, 4   ;;  %s915_s6 = smov %s577_s7 }
  0xe4   : > { %s916_s7 = smov %s581_s8  ;;  %s917_s8 = smov %s638_s15 }
  0xe5   : > { %s918_s9 = smov %s626_s12  ;;  %16 = sbr.rel (!%p14_p8) target bundleno = 5 (0x5), region = 69 }
  0xea   :  { %377 = vsyncpa [#allocation3], 1 }
  0xeb   :  { %379 = vsyncpa [#allocation3 + $0x1], 1 }
  0xec   :  { %380 = vsyncpa [#allocation4], 1 }
  0xed   :  { %382 = vsyncpa [#allocation4 + $0x1], 1 }

</bundles_post_ra>
